<compile_context>
chip_gen: v7x
topology: tpu7x:2x2x1
jax: 0.10.0
libtpu: 0.0.40
codegen_flags: <defaults>
</compile_context>

<pallas_src>
from functools import partial

import jax
import jax.numpy as jnp
from jax.experimental import pallas as pl
from jax.experimental.pallas import tpu as pltpu

NEG_PAD = -1e30  # "minus infinity" for padded class columns (finite -> no NaN in exp/max)


def _round_up(a, m):
    return ((a + m - 1) // m) * m


def head_kernel(pooled_ref, lab_ref, col_ref, w1_ref, b1_ref, w2_ref, b2_ref,
                out_ref, *, num_classes):
    # pooled_ref: [B_TILE, S] f32   (AdaptiveAvgPool1d already applied in the wrapper)
    # lab_ref:    [B_TILE, 1] int32
    # col_ref:    [1, C_pad] int32  resident column ids (no per-step iota)
    # w1_ref:     [S, S] f32        b1_ref: [1, S] f32
    # w2_ref:     [S, C_pad] f32 (zero cols past C)   b2_ref: [1, C_pad] f32 (NEG_PAD past C)
    # out_ref:    [B_TILE, C_pad] f32  (cols [0, C) = logits, col C = per-example NLL)

    # Linear(seq_len, seq_len) + ReLU (Dropout is identity in eval).
    h = jnp.dot(pooled_ref[...], w1_ref[...],
                preferred_element_type=jnp.float32) + b1_ref[...]
    h = jnp.maximum(h, 0.0)

    # Linear(seq_len, num_classes). Padded columns have W2 = 0 and b2 = NEG_PAD, so they
    # behave as -inf and drop out of the logsumexp without an explicit mask.
    logits = jnp.dot(h, w2_ref[...],
                     preferred_element_type=jnp.float32) + b2_ref[...]   # [B_TILE, C_pad]

    # CrossEntropy per example: logsumexp over the classes minus the picked logit.
    m = jnp.max(logits, axis=-1, keepdims=True)                          # [B_TILE, 1]
    lse = m + jnp.log(jnp.sum(jnp.exp(logits - m), axis=-1, keepdims=True))
    col = col_ref[...]                                                   # [1, C_pad]
    picked = jnp.sum(jnp.where(col == lab_ref[...], logits, 0.0),
                     axis=-1, keepdims=True)                             # [B_TILE, 1]
    nll = lse - picked

    # Lane-dense packed output tile: logits everywhere, NLL overwrites column C.
    out_ref[...] = jnp.where(col == num_classes, nll, logits)


def fuzzy_trans_forward(x, label, params, *, b_tile=256):
    """x: [B, S, E] float32, label: [B] int. Returns (loss, pred[B, C])."""
    B, S, E = x.shape
    C = params["w2"].shape[1]

    # TODO(synk): FuzzyDualAttention (self.feature_extractor) is not defined in the
    # provided source, so it is treated as identity here.
    feats = x

    # AdaptiveAvgPool1d(1) over the embed axis, [B, S, E] -> [B, S]. While the feature
    # extractor is identity, this mean is the single HBM pass over x; the kernel only
    # sees the tiny pooled rows.
    pooled = jnp.mean(feats, axis=2)                                     # [B, S] f32

    # Batch tile: 256 fills the MXU M side on v6e/v7x (pass b_tile=128 for v5e); clamped
    # for small batches. Per-step VMEM blocks total < 256 KiB -> safe under v7x's 64 MiB.
    B_TILE = min(b_tile, _round_up(B, 8))
    B_pad = _round_up(B, B_TILE)
    C_pad = _round_up(C + 1, 128)            # lane-dense output, room for the NLL column

    # Pads below touch only the tiny pooled / label / weight arrays (never full x).
    pooled = jnp.pad(pooled, ((0, B_pad - B), (0, 0)))
    lab2d = jnp.pad(label.astype(jnp.int32)[:, None], ((0, B_pad - B), (0, 0)))
    col_ids = jnp.arange(C_pad, dtype=jnp.int32)[None, :]                # hoisted iota

    w1 = params["w1"]                                                    # [S, S] f32
    b1 = params["b1"]                                                    # [1, S] f32
    w2 = jnp.pad(params["w2"], ((0, 0), (0, C_pad - C)))                 # [S, C_pad] f32
    b2 = jnp.pad(params["b2"], ((0, 0), (0, C_pad - C)),
                 constant_values=NEG_PAD)                                # [1, C_pad] f32

    out = pl.pallas_call(
        partial(head_kernel, num_classes=C),
        grid=(B_pad // B_TILE,),
        in_specs=[
            pl.BlockSpec((B_TILE, S), lambda i: (i, 0)),     # pooled rows (pipelined)
            pl.BlockSpec((B_TILE, 1), lambda i: (i, 0)),     # labels
            pl.BlockSpec((1, C_pad), lambda i: (0, 0)),      # column ids (resident)
            pl.BlockSpec((S, S), lambda i: (0, 0)),          # W1 (resident)
            pl.BlockSpec((1, S), lambda i: (0, 0)),          # b1
            pl.BlockSpec((S, C_pad), lambda i: (0, 0)),      # W2 (resident)
            pl.BlockSpec((1, C_pad), lambda i: (0, 0)),      # b2
        ],
        out_specs=pl.BlockSpec((B_TILE, C_pad), lambda i: (i, 0)),
        out_shape=jax.ShapeDtypeStruct((B_pad, C_pad), jnp.float32),
        compiler_params=pltpu.CompilerParams(
            dimension_semantics=("parallel",)),              # 2-TC sharding on v7x when grid >= 2
    )(pooled, lab2d, col_ids, w1, b1, w2, b2)

    pred = out[:B, :C]                       # logits (squeeze(1) is a no-op for C > 1)
    loss = jnp.mean(out[:B, C])              # CrossEntropyLoss: mean of per-example NLL
    return loss, pred


def init_params(key, seq_len, num_classes):
    """Matches FuzzyTrans._init_weights: xavier_uniform weights, zero biases.
    Weights are stored (in, out) so the kernel uses x @ W (same math as PyTorch x @ W.T)."""
    k1, k2 = jax.random.split(key)

    def xavier(k, fan_in, fan_out):
        bound = (6.0 / (fan_in + fan_out)) ** 0.5
        return jax.random.uniform(k, (fan_in, fan_out), jnp.float32, -bound, bound)

    return {
        "w1": xavier(k1, seq_len, seq_len),
        "b1": jnp.zeros((1, seq_len), jnp.float32),
        "w2": xavier(k2, seq_len, num_classes),
        "b2": jnp.zeros((1, num_classes), jnp.float32),
    }


if __name__ == "__main__":
    # Module defaults: seq_len=40, embed_dim=33, num_classes=12; small batch.
    B, S, E, C = 2, 40, 33, 12

    key = jax.random.PRNGKey(0)
    kx, kl, kp = jax.random.split(key, 3)

    x = jax.random.normal(kx, (B, S, E), dtype=jnp.float32)
    label = jax.random.randint(kl, (B,), 0, C, dtype=jnp.int32)
    params = init_params(kp, S, C)

    loss, pred = jax.jit(fuzzy_trans_forward)(x, label, params)
    jax.block_until_ready((loss, pred))

    assert pred.shape == (B, C) and loss.shape == ()
    assert bool(jnp.isfinite(loss)) and bool(jnp.all(jnp.isfinite(pred)))
    print("KERNEL_OK")
</pallas_src>

<mosaic_0001>
module attributes {stable_mosaic.version = 11 : i64} {
  func.func @head_kernel(%arg0: i32, %arg1: memref<8x40xf32, #tpu.memory_space<vmem>>, %arg2: memref<8x1xi32, #tpu.memory_space<vmem>>, %arg3: memref<1x128xi32, #tpu.memory_space<vmem>>, %arg4: memref<40x40xf32, #tpu.memory_space<vmem>>, %arg5: memref<1x40xf32, #tpu.memory_space<vmem>>, %arg6: memref<40x128xf32, #tpu.memory_space<vmem>>, %arg7: memref<1x128xf32, #tpu.memory_space<vmem>>, %arg8: memref<8x128xf32, #tpu.memory_space<vmem>>) attributes {dimension_semantics = [#tpu.dimension_semantics<parallel>], iteration_bounds = array<i64: 1>, scalar_prefetch = 0 : i64, scratch_operands = 0 : i64, tpu.core_type = #tpu.core_type<tc>, window_params = [{transform_indices = @transform_0, window_bounds = array<i64: 8, 40>}, {transform_indices = @transform_1, window_bounds = array<i64: 8, 1>}, {pipeline_mode = #tpu.pipeline_mode<synchronous>, transform_indices = @transform_2, window_bounds = array<i64: 1, 128>}, {pipeline_mode = #tpu.pipeline_mode<synchronous>, transform_indices = @transform_3, window_bounds = array<i64: 40, 40>}, {pipeline_mode = #tpu.pipeline_mode<synchronous>, transform_indices = @transform_4, window_bounds = array<i64: 1, 40>}, {pipeline_mode = #tpu.pipeline_mode<synchronous>, transform_indices = @transform_5, window_bounds = array<i64: 40, 128>}, {pipeline_mode = #tpu.pipeline_mode<synchronous>, transform_indices = @transform_6, window_bounds = array<i64: 1, 128>}, {transform_indices = @transform_7, window_bounds = array<i64: 8, 128>}]} {
    %c0 = arith.constant 0 : index
    %c0_0 = arith.constant 0 : index
    %0 = vector.load %arg1[%c0, %c0_0] : memref<8x40xf32, #tpu.memory_space<vmem>>, vector<8x40xf32>
    %c0_1 = arith.constant 0 : index
    %c0_2 = arith.constant 0 : index
    %1 = vector.load %arg4[%c0_1, %c0_2] : memref<40x40xf32, #tpu.memory_space<vmem>>, vector<40x40xf32>
    %cst = arith.constant dense<0.000000e+00> : vector<8x40xf32>
    %2 = tpu.matmul %0, %1, %cst {dimension_numbers = #tpu.dot_dimension_numbers<[1], [0], [0], [1], [0, 0, 1, 1], [], []>} : vector<8x40xf32>, vector<40x40xf32>, vector<8x40xf32> -> vector<8x40xf32>
    %c0_3 = arith.constant 0 : index
    %c0_4 = arith.constant 0 : index
    %3 = vector.load %arg5[%c0_3, %c0_4] : memref<1x40xf32, #tpu.memory_space<vmem>>, vector<1x40xf32>
    %4 = vector.broadcast %3 : vector<1x40xf32> to vector<8x40xf32>
    %5 = arith.addf %2, %4 : vector<8x40xf32>
    %cst_5 = arith.constant 0.000000e+00 : f32
    %6 = vector.broadcast %cst_5 : f32 to vector<8x40xf32>
    %7 = arith.maximumf %5, %6 : vector<8x40xf32>
    %c0_6 = arith.constant 0 : index
    %c0_7 = arith.constant 0 : index
    %8 = vector.load %arg6[%c0_6, %c0_7] : memref<40x128xf32, #tpu.memory_space<vmem>>, vector<40x128xf32>
    %cst_8 = arith.constant dense<0.000000e+00> : vector<8x128xf32>
    %9 = tpu.matmul %7, %8, %cst_8 {dimension_numbers = #tpu.dot_dimension_numbers<[1], [0], [0], [1], [0, 0, 1, 1], [], []>} : vector<8x40xf32>, vector<40x128xf32>, vector<8x128xf32> -> vector<8x128xf32>
    %c0_9 = arith.constant 0 : index
    %c0_10 = arith.constant 0 : index
    %10 = vector.load %arg7[%c0_9, %c0_10] : memref<1x128xf32, #tpu.memory_space<vmem>>, vector<1x128xf32>
    %11 = vector.broadcast %10 : vector<1x128xf32> to vector<8x128xf32>
    %12 = arith.addf %9, %11 : vector<8x128xf32>
    %cst_11 = arith.constant dense<0xFF800000> : vector<8xf32>
    %13 = vector.multi_reduction <maximumf>, %12, %cst_11 [1] : vector<8x128xf32> to vector<8xf32>
    %14 = vector.shape_cast %13 : vector<8xf32> to vector<8x1xf32>
    %15 = vector.broadcast %14 : vector<8x1xf32> to vector<8x128xf32>
    %16 = arith.subf %12, %15 : vector<8x128xf32>
    %17 = math.exp %16 : vector<8x128xf32>
    %cst_12 = arith.constant dense<0.000000e+00> : vector<8xf32>
    %18 = vector.multi_reduction <add>, %17, %cst_12 [1] : vector<8x128xf32> to vector<8xf32>
    %19 = vector.shape_cast %18 : vector<8xf32> to vector<8x1xf32>
    %20 = math.log %19 : vector<8x1xf32>
    %21 = arith.addf %14, %20 : vector<8x1xf32>
    %c0_13 = arith.constant 0 : index
    %c0_14 = arith.constant 0 : index
    %22 = vector.load %arg3[%c0_13, %c0_14] : memref<1x128xi32, #tpu.memory_space<vmem>>, vector<1x128xi32>
    %c0_15 = arith.constant 0 : index
    %c0_16 = arith.constant 0 : index
    %23 = vector.load %arg2[%c0_15, %c0_16] : memref<8x1xi32, #tpu.memory_space<vmem>>, vector<8x1xi32>
    %24 = vector.broadcast %22 : vector<1x128xi32> to vector<8x128xi32>
    %25 = vector.broadcast %23 : vector<8x1xi32> to vector<8x128xi32>
    %26 = arith.cmpi eq, %24, %25 : vector<8x128xi32>
    %cst_17 = arith.constant 0.000000e+00 : f32
    %27 = vector.broadcast %cst_17 : f32 to vector<8x128xf32>
    %28 = arith.select %26, %12, %27 : vector<8x128xi1>, vector<8x128xf32>
    %cst_18 = arith.constant dense<0.000000e+00> : vector<8xf32>
    %29 = vector.multi_reduction <add>, %28, %cst_18 [1] : vector<8x128xf32> to vector<8xf32>
    %30 = vector.shape_cast %29 : vector<8xf32> to vector<8x1xf32>
    %31 = arith.subf %21, %30 : vector<8x1xf32>
    %c12_i32 = arith.constant 12 : i32
    %32 = vector.broadcast %c12_i32 : i32 to vector<1x128xi32>
    %33 = arith.cmpi eq, %22, %32 : vector<1x128xi32>
    %34 = vector.shape_cast %33 : vector<1x128xi1> to vector<1x128xi1>
    %35 = vector.broadcast %34 : vector<1x128xi1> to vector<8x128xi1>
    %36 = vector.shape_cast %31 : vector<8x1xf32> to vector<8x1xf32>
    %37 = vector.broadcast %36 : vector<8x1xf32> to vector<8x128xf32>
    %38 = arith.select %35, %37, %12 : vector<8x128xi1>, vector<8x128xf32>
    %c0_19 = arith.constant 0 : index
    %c0_20 = arith.constant 0 : index
    %39 = vector.load %arg8[%c0_19, %c0_20] : memref<8x128xf32, #tpu.memory_space<vmem>>, vector<8x128xf32>
    tpu.vector_store %arg8[%c0_19, %c0_20], %38 {strides = array<i32>} : memref<8x128xf32, #tpu.memory_space<vmem>>, vector<8x128xf32>,
    return
  }
  func.func @transform_0(%arg0: i32) -> (i32, i32) {
    %c0_i32 = arith.constant 0 : i32
    %c0_i32_0 = arith.constant 0 : i32
    return %arg0, %c0_i32 : i32, i32
  }
  func.func @transform_1(%arg0: i32) -> (i32, i32) {
    %c0_i32 = arith.constant 0 : i32
    %c0_i32_0 = arith.constant 0 : i32
    return %arg0, %c0_i32 : i32, i32
  }
  func.func @transform_2(%arg0: i32) -> (i32, i32) {
    %c0_i32 = arith.constant 0 : i32
    %c0_i32_0 = arith.constant 0 : i32
    %c0_i32_1 = arith.constant 0 : i32
    return %c0_i32, %c0_i32_0 : i32, i32
  }
  func.func @transform_3(%arg0: i32) -> (i32, i32) {
    %c0_i32 = arith.constant 0 : i32
    %c0_i32_0 = arith.constant 0 : i32
    %c0_i32_1 = arith.constant 0 : i32
    return %c0_i32, %c0_i32_0 : i32, i32
  }
  func.func @transform_4(%arg0: i32) -> (i32, i32) {
    %c0_i32 = arith.constant 0 : i32
    %c0_i32_0 = arith.constant 0 : i32
    %c0_i32_1 = arith.constant 0 : i32
    return %c0_i32, %c0_i32_0 : i32, i32
  }
  func.func @transform_5(%arg0: i32) -> (i32, i32) {
    %c0_i32 = arith.constant 0 : i32
    %c0_i32_0 = arith.constant 0 : i32
    %c0_i32_1 = arith.constant 0 : i32
    return %c0_i32, %c0_i32_0 : i32, i32
  }
  func.func @transform_6(%arg0: i32) -> (i32, i32) {
    %c0_i32 = arith.constant 0 : i32
    %c0_i32_0 = arith.constant 0 : i32
    %c0_i32_1 = arith.constant 0 : i32
    return %c0_i32, %c0_i32_0 : i32, i32
  }
  func.func @transform_7(%arg0: i32) -> (i32, i32) {
    %c0_i32 = arith.constant 0 : i32
    %c0_i32_0 = arith.constant 0 : i32
    return %arg0, %c0_i32 : i32, i32
  }
}

</mosaic_0001>

<bundles_post_ra>
// kernel: fuzzy_trans_forward.1
= control target key start
LH: loop header
LB: loop body
LE: loop exit
PB: predicated region body
PF: predicated region fallthrough
CT: control target
= control target key end

     0   :  { %v299_v0 = vmov 0.0|0.0   ;;  %vm300_vm0 = vmmov 0   ;;  %v301_v4 = vmov 0.0   ;;  %vm39_vm1 = vcmask 326656   ;;  %s393_s3 = inlined_call_operand.vmem [shape: f32[40,40], index: 3, kind: input, shape index: {}]   ;;  %s394_s5 = inlined_call_operand.vmem [shape: f32[40,128], index: 5, kind: input, shape index: {}]   ;;  %s395_s0 = inlined_call_operand.vmem [shape: f32[8,40], index: 0, kind: input, shape index: {}]   ;;  %s396_s4 = inlined_call_operand.vmem [shape: f32[1,40], index: 4, kind: input, shape index: {}]   ;;  %s397_s6 = inlined_call_operand.vmem [shape: f32[1,128], index: 6, kind: input, shape index: {}]   ;;  %s398_s1 = inlined_call_operand.vmem [shape: s32[8,1], index: 1, kind: input, shape index: {}]   ;;  %s399_s2 = inlined_call_operand.vmem [shape: s32[1,128], index: 2, kind: input, shape index: {}]   ;;  %s400_s7 = inlined_call_operand.vmem [shape: f32[8,128], index: 7, kind: output, shape index: {}]  }
   0x1   :  { %278 = vmatprep.subr.bf16.mxu0 %v299_v0  ;;  %v27_v1 = vld [vmem:[%s393_s3] sm:$0xff]  ;;  %v28_v2 = vld [vmem:[%s393_s3 + $0x8] sm:$0xff]  ;;  %v29_v3 = vld [vmem:[%s393_s3 + $0x10] sm:$0xff]  ;;  %262 = vmatprep.mubr.msk.f32.mxu0 %vm300_vm0, %v301_v4  ;;  %v302_v22 = vmov 0   ;;  %v211_v28 = vlaneseq }
   0x2   :  { %v279_v5 = vpack.c.bf16 %v28_v2, %v27_v1  ;;  %v30_v6 = vld [vmem:[%s393_s3 + $0x18] sm:$0xff]  ;;  %284 = vmatprep.subr.bf16.mxu1 %v299_v0  ;;  %275 = vmatprep.mubr.msk.f32.mxu1 %vm300_vm0, %v301_v4  ;;  %v114_v7 = vld [vmem:[%s394_s5] sm:$0xff]  ;;  %v115_v8 = vld [vmem:[%s394_s5 + $0x8] sm:$0xff] }
   0x3   :  { %v282_v9 = vpack.c.bf16 %v30_v6, %v29_v3  ;;  %v285_v10 = vpack.c.bf16 %v115_v8, %v114_v7  ;;  %v31_v11 = vld [vmem:[%s393_s3 + $0x20] sm:$0xff]  ;;  %v116_v13 = vld [vmem:[%s394_s5 + $0x10] sm:$0xff]  ;;  %v117_v14 = vld [vmem:[%s394_s5 + $0x18] sm:$0xff]  ;;  %294 = vset.pattern.permute.xlu0 %v302_v22  ;;  %v212_v32 = vshrl.u32 %v211_v28, 7 }
   0x4   :  { %280 = vmatpush3.bf16.msra.mxu0 %v279_v5  ;;  %v26_v12 = vld [vmem:[%s395_s0] sm:$0xff]  ;;  %v288_v15 = vpack.c.bf16 %v117_v14, %v116_v13 }
   0x5   :  { %281 = vmatprep.subr.bf16.mxu0 %v299_v0  ;;  %286 = vmatpush3.bf16.msra.mxu1 %v285_v10  ;;  %v118_v16 = vld [vmem:[%s394_s5 + $0x20] sm:$0xff]  ;;  %v213_v33 = vsub.s32 0, %v212_v32 }
   0x6   :  { %287 = vmatprep.subr.bf16.mxu1 %v299_v0  ;;  %v236_v17 = vld [vmem:[%s396_s4] ss:$0 sm:$0xff] }
   0x7   :  { %v238_v23 = vld [vmem:[%s397_s6] ss:$0 sm:$0xff] }
   0x8   :  { %283 = vmatpush3.bf16.msra.mxu0 %v282_v9  ;;  %v210_v27 = vld [vmem:[%s398_s1] sm:$0xff] }
   0x9   :  { %260 = vmatprep.subr.mxu0 %v301_v4  ;;  %289 = vmatpush3.bf16.msra.mxu1 %v288_v15  ;;  %v209_v34 = vld [vmem:[%s399_s2] sm:$0x1] }
   0xa   :  { %273 = vmatprep.subr.mxu1 %v301_v4  ;;  %v214_v35 = vrot.slane %v209_v34, %v213_v33  ;;  %vm223_vm3 = vcmp.eq.s32.totalorder %v209_v34, 12 }
   0xb   :  { %v224_v40 = vsel %vm223_vm3, 1, %v302_v22 }
   0xc   :  { %261 = vmatpush3.msra.mxu0 %v31_v11  ;;  %v228_v42 = vrot.slane %v224_v40, %v213_v33 }
   0xd   :  { %263 = vmatmul.mubr.msk.f32.vlgmr.msra.gmra.mrb[0].mxu0 %vm39_vm1, %v26_v12  ;;  %274 = vmatpush3.msra.mxu1 %v118_v16 }
   0xe   :  { %vm229_vm4 = vcmp.eq.s32.totalorder %v228_v42, 1 }
  0xe0   :  { %v109_v18 = vpop.f32.mrb[0].mxu0 }
  0xe1   :  { %v110_v19 = vadd.f32 %v236_v17, %v109_v18  ;;  %v264_v20 = vpop.f32.mrb[1].mxu0 }
  0xe3   :  { %v113_v21 = vmax.f32 %v110_v19, 0.0 }
  0xe5   :  { %276 = vmatmul.mubr.msk.f32.vlgmr.msra.gmra.mrb[0].mxu1 %vm39_vm1, %v113_v21 }
 0x1b8   :  { %v195_v24 = vpop.f32.mrb[0].mxu1 }
 0x1b9   :  { %v196_v25 = vadd.f32 %v238_v23, %v195_v24  ;;  %v277_v26 = vpop.f32.mrb[1].mxu1 }
 0x1bb   :  { %199 = vmax.xlane.f32.xlu0 %v196_v25 }
 0x1d1   :  { %216 = vperm.xlu0 %294, %v210_v27  }
 0x248   :  { %v200_v29 = vpop.xlane.xlu0 %199 }
 0x249   :  { %v201_v30 = vsub.f32 %v196_v25, %v200_v29 }
 0x24b   :  { %v202_v31 = vmul.f32 1.442695, %v201_v30 }
 0x24d   :  { %295 = vpow2.f32 %v202_v31 }
 0x250   :  { %v217_v36 = vpop.permute.xlu0 %216 }
 0x251   :  { %vm218_vm2 = vcmp.eq.s32.totalorder %v214_v35, %v217_v36 }
 0x252   :  { %v219_v38 = vsel %vm218_vm2, %v196_v25, 0.0 }
 0x257   :  { %v296_v37 = vpop.eup %295 }
 0x258   :  { %204 = vadd.xlane.f32.xlu1 %v296_v37 }
 0x25c   :  { %220 = vadd.xlane.f32.xlu1 %v219_v38 }
 0x2e5   :  { %v205_v39 = vpop.xlane.xlu1 %204 }
 0x2e6   :  { %297 = vlog2.f32 %v205_v39 }
 0x2e9   :  { %v221_v45 = vpop.xlane.xlu1 %220 }
 0x2f0   :  { %v298_v41 = vpop.eup %297 }
 0x2f1   :  { %v207_v43 = vmul.f32 0.6931472, %v298_v41 }
 0x2f3   :  { %v208_v44 = vadd.f32 %v207_v43, %v200_v29 }
 0x2f5   :  { %v222_v46 = vsub.f32 %v208_v44, %v221_v45 }
 0x2f7   :  { %v230_v47 = vsel %vm229_vm4, %v222_v46, %v196_v25 }
 0x2f8   :  { %231 = vst [vmem:[%s400_s7] sm:$0xff] %v230_v47 }

</bundles_post_ra>
